<compile_context>
chip_gen: v7x
topology: tpu7x:2x2x1
jax: 0.10.0
libtpu: 0.0.40
codegen_flags: <defaults>
</compile_context>

<pallas_src>
import jax
import jax.numpy as jnp
from jax.experimental import pallas as pl
from jax.experimental.pallas import tpu as pltpu


def _round_up(x, m):
    return (x + m - 1) // m * m


def model_kernel(emb_ref,            # (S, Bp, Ep) f32  time-major embeddings
                 wv_ref, bvw_ref,    # V linear: (Ep, Ep), combined bias bv+bw (1, Ep)
                 ww_ref,             # W linear: (Ep, Ep)   (bias folded into bvw)
                 wu_ref, bu_ref,     # U linear: (Ep, Ep), (1, Ep)
                 wc_ref, bc_ref,     # classify: (Ep, Vp), (1, Vp)
                 out_ref):           # (Bp, Vp) f32 logits
    S, B, E = emb_ref.shape

    # --- hoisted input projection: one (S*B, E) @ (E, E) matmul ----------
    xv = jnp.dot(emb_ref[...].reshape(S * B, E), wv_ref[...],
                 preferred_element_type=jnp.float32) + bvw_ref[...]
    xv = xv.reshape(S, B, E)

    ww = ww_ref[...]                                   # hoisted weight read

    # --- recurrence: only p @ ww on the serial path, fully unrolled ------
    p = jnp.zeros((B, E), jnp.float32)
    acc = jnp.zeros((B, E), jnp.float32)
    for i in range(S):                                 # S static & small
        s = jnp.maximum(
            xv[i] + jnp.dot(p, ww, preferred_element_type=jnp.float32), 0.0)
        acc = acc + s                                  # sum of s_t
        p = s

    # --- epilogue: mean, U projection (loop-invariant), classifier -------
    mean_s = acc * (1.0 / S)
    h = jnp.dot(mean_s, wu_ref[...],
                preferred_element_type=jnp.float32) + bu_ref[...]
    out_ref[...] = (jnp.dot(h, wc_ref[...],
                            preferred_element_type=jnp.float32)
                    + bc_ref[...])


def model_forward(token_ids, params):
    """token_ids: (B, S) int32 -> logits (B, vocab) f32."""
    emb_table = params["embedding"]                    # (vocab, E)
    B, S = token_ids.shape
    E = emb_table.shape[1]
    V = params["wc"].shape[1]

    # Pad to TPU-friendly tiles: sublane multiple of 8, lane multiple of 128.
    Bp = _round_up(B, 8)
    Ep = _round_up(E, 128)
    Vp = _round_up(V, 128)

    f32 = jnp.float32
    emb_t = jnp.pad(emb_table.astype(f32), ((0, 0), (0, Ep - E)))
    wv = jnp.pad(params["wv"].astype(f32), ((0, Ep - E), (0, Ep - E)))
    ww = jnp.pad(params["ww"].astype(f32), ((0, Ep - E), (0, Ep - E)))
    wu = jnp.pad(params["wu"].astype(f32), ((0, Ep - E), (0, Ep - E)))
    wc = jnp.pad(params["wc"].astype(f32), ((0, Ep - E), (0, Vp - V)))
    bvw = jnp.pad((params["bv"] + params["bw"]).astype(f32),
                  ((0, 0), (0, Ep - E)))               # combined bv + bw
    bu = jnp.pad(params["bu"].astype(f32), ((0, 0), (0, Ep - E)))
    bc = jnp.pad(params["bc"].astype(f32), ((0, 0), (0, Vp - V)))

    # glue: embedding gather + time-major transpose (padded batch rows use id 0)
    # TODO(synk): at real sizes, gather rows in-kernel via scalar-prefetched
    # token ids (PrefetchScalarGridSpec) to avoid the HBM round trip, chunk
    # over S, and tile the classifier over V for large vocab / v7x VMEM.
    tok = jnp.pad(token_ids, ((0, Bp - B), (0, 0)))
    emb = jnp.take(emb_t, tok, axis=0)                 # (Bp, S, Ep)
    emb_sbe = jnp.transpose(emb, (1, 0, 2))            # (S, Bp, Ep)

    vmem = pl.BlockSpec(memory_space=pltpu.MemorySpace.VMEM)
    out = pl.pallas_call(
        model_kernel,
        out_shape=jax.ShapeDtypeStruct((Bp, Vp), jnp.float32),
        in_specs=[vmem] * 8,
        out_specs=vmem,
        compiler_params=pltpu.CompilerParams(vmem_limit_bytes=32 * 1024 * 1024),
    )(emb_sbe, wv, bvw, ww, wu, bu, wc, bc)

    return out[:B, :V]


def reference_forward(token_ids, params):
    """Pure-JAX reference mirroring the PyTorch forward."""
    emb = jnp.take(params["embedding"], token_ids, axis=0)   # (B, S, E)
    B, S, E = emb.shape
    p = jnp.zeros((B, E), jnp.float32)
    outs = []
    for i in range(S):
        x_v = emb[:, i, :] @ params["wv"] + params["bv"]
        p_w = p @ params["ww"] + params["bw"]
        s = jnp.maximum(x_v + p_w, 0.0)
        outs.append(s @ params["wu"] + params["bu"])
        p = s
    rnn_out = jnp.stack(outs, axis=1)                        # (B, S, E)
    rnn_mean = jnp.mean(rnn_out, axis=1)
    return rnn_mean @ params["wc"] + params["bc"]


def init_params(key, vocab_size, emb_dim):
    ks = jax.random.split(key, 9)
    scale = 0.1
    return {
        "embedding": scale * jax.random.normal(ks[0], (vocab_size, emb_dim), jnp.float32),
        # Linear weights stored as (in, out)  (pre-transposed vs torch (out, in))
        "wv": scale * jax.random.normal(ks[1], (emb_dim, emb_dim), jnp.float32),
        "bv": scale * jax.random.normal(ks[2], (1, emb_dim), jnp.float32),
        "ww": scale * jax.random.normal(ks[3], (emb_dim, emb_dim), jnp.float32),
        "bw": scale * jax.random.normal(ks[4], (1, emb_dim), jnp.float32),
        "wu": scale * jax.random.normal(ks[5], (emb_dim, emb_dim), jnp.float32),
        "bu": scale * jax.random.normal(ks[6], (1, emb_dim), jnp.float32),
        "wc": scale * jax.random.normal(ks[7], (emb_dim, vocab_size), jnp.float32),
        "bc": scale * jax.random.normal(ks[8], (1, vocab_size), jnp.float32),
    }


if __name__ == "__main__":
    # Small, deterministic config consistent with the module's forward.
    vocab_size, emb_dim = 64, 32
    batch, seq_len = 2, 8

    key = jax.random.PRNGKey(0)
    k_params, k_tokens = jax.random.split(key)
    params = init_params(k_params, vocab_size, emb_dim)
    token_ids = jax.random.randint(k_tokens, (batch, seq_len), 0, vocab_size,
                                   dtype=jnp.int32)

    logits = model_forward(token_ids, params)
    jax.block_until_ready(logits)

    ref = reference_forward(token_ids, params)
    assert logits.shape == (batch, vocab_size)
    assert jnp.allclose(logits, ref, atol=1e-4, rtol=1e-4), "mismatch vs reference"

    # TODO(synk): CrossEntropyLoss (label path) not implemented — forward
    # without labels returns predicts, which is what this kernel reproduces.

    print("KERNEL_OK")
</pallas_src>

<mosaic_0001>
module attributes {stable_mosaic.version = 11 : i64} {
  func.func @model_kernel(%arg0: memref<8x8x128xf32, #tpu.memory_space<vmem>>, %arg1: memref<128x128xf32, #tpu.memory_space<vmem>>, %arg2: memref<1x128xf32, #tpu.memory_space<vmem>>, %arg3: memref<128x128xf32, #tpu.memory_space<vmem>>, %arg4: memref<128x128xf32, #tpu.memory_space<vmem>>, %arg5: memref<1x128xf32, #tpu.memory_space<vmem>>, %arg6: memref<128x128xf32, #tpu.memory_space<vmem>>, %arg7: memref<1x128xf32, #tpu.memory_space<vmem>>, %arg8: memref<8x128xf32, #tpu.memory_space<vmem>>) attributes {dimension_semantics = [], scalar_prefetch = 0 : i64, scratch_operands = 0 : i64, tpu.core_type = #tpu.core_type<tc>} {
    %c0 = arith.constant 0 : index
    %c0_0 = arith.constant 0 : index
    %c0_1 = arith.constant 0 : index
    %0 = vector.load %arg0[%c0, %c0_0, %c0_1] : memref<8x8x128xf32, #tpu.memory_space<vmem>>, vector<8x8x128xf32>
    %1 = vector.shape_cast %0 : vector<8x8x128xf32> to vector<64x128xf32>
    %c0_2 = arith.constant 0 : index
    %c0_3 = arith.constant 0 : index
    %2 = vector.load %arg1[%c0_2, %c0_3] : memref<128x128xf32, #tpu.memory_space<vmem>>, vector<128x128xf32>
    %cst = arith.constant dense<0.000000e+00> : vector<64x128xf32>
    %3 = tpu.matmul %1, %2, %cst {dimension_numbers = #tpu.dot_dimension_numbers<[1], [0], [0], [1], [0, 0, 1, 1], [], []>} : vector<64x128xf32>, vector<128x128xf32>, vector<64x128xf32> -> vector<64x128xf32>
    %c0_4 = arith.constant 0 : index
    %c0_5 = arith.constant 0 : index
    %4 = vector.load %arg2[%c0_4, %c0_5] : memref<1x128xf32, #tpu.memory_space<vmem>>, vector<1x128xf32>
    %5 = vector.broadcast %4 : vector<1x128xf32> to vector<64x128xf32>
    %6 = arith.addf %3, %5 : vector<64x128xf32>
    %7 = vector.shape_cast %6 : vector<64x128xf32> to vector<8x8x128xf32>
    %c0_6 = arith.constant 0 : index
    %c0_7 = arith.constant 0 : index
    %8 = vector.load %arg3[%c0_6, %c0_7] : memref<128x128xf32, #tpu.memory_space<vmem>>, vector<128x128xf32>
    %cst_8 = arith.constant 0.000000e+00 : f32
    %9 = vector.broadcast %cst_8 : f32 to vector<8x128xf32>
    %cst_9 = arith.constant 0.000000e+00 : f32
    %10 = vector.broadcast %cst_9 : f32 to vector<8x128xf32>
    %11 = vector.extract_strided_slice %7 {offsets = [0, 0, 0], sizes = [1, 8, 128], strides = [1, 1, 1]} : vector<8x8x128xf32> to vector<1x8x128xf32>
    %12 = vector.shape_cast %11 : vector<1x8x128xf32> to vector<8x128xf32>
    %cst_10 = arith.constant dense<0.000000e+00> : vector<8x128xf32>
    %13 = tpu.matmul %9, %8, %cst_10 {dimension_numbers = #tpu.dot_dimension_numbers<[1], [0], [0], [1], [0, 0, 1, 1], [], []>} : vector<8x128xf32>, vector<128x128xf32>, vector<8x128xf32> -> vector<8x128xf32>
    %14 = arith.addf %12, %13 : vector<8x128xf32>
    %cst_11 = arith.constant 0.000000e+00 : f32
    %15 = vector.broadcast %cst_11 : f32 to vector<8x128xf32>
    %16 = arith.maximumf %14, %15 : vector<8x128xf32>
    %17 = arith.addf %10, %16 : vector<8x128xf32>
    %18 = vector.extract_strided_slice %7 {offsets = [1, 0, 0], sizes = [1, 8, 128], strides = [1, 1, 1]} : vector<8x8x128xf32> to vector<1x8x128xf32>
    %19 = vector.shape_cast %18 : vector<1x8x128xf32> to vector<8x128xf32>
    %cst_12 = arith.constant dense<0.000000e+00> : vector<8x128xf32>
    %20 = tpu.matmul %16, %8, %cst_12 {dimension_numbers = #tpu.dot_dimension_numbers<[1], [0], [0], [1], [0, 0, 1, 1], [], []>} : vector<8x128xf32>, vector<128x128xf32>, vector<8x128xf32> -> vector<8x128xf32>
    %21 = arith.addf %19, %20 : vector<8x128xf32>
    %cst_13 = arith.constant 0.000000e+00 : f32
    %22 = vector.broadcast %cst_13 : f32 to vector<8x128xf32>
    %23 = arith.maximumf %21, %22 : vector<8x128xf32>
    %24 = arith.addf %17, %23 : vector<8x128xf32>
    %25 = vector.extract_strided_slice %7 {offsets = [2, 0, 0], sizes = [1, 8, 128], strides = [1, 1, 1]} : vector<8x8x128xf32> to vector<1x8x128xf32>
    %26 = vector.shape_cast %25 : vector<1x8x128xf32> to vector<8x128xf32>
    %cst_14 = arith.constant dense<0.000000e+00> : vector<8x128xf32>
    %27 = tpu.matmul %23, %8, %cst_14 {dimension_numbers = #tpu.dot_dimension_numbers<[1], [0], [0], [1], [0, 0, 1, 1], [], []>} : vector<8x128xf32>, vector<128x128xf32>, vector<8x128xf32> -> vector<8x128xf32>
    %28 = arith.addf %26, %27 : vector<8x128xf32>
    %cst_15 = arith.constant 0.000000e+00 : f32
    %29 = vector.broadcast %cst_15 : f32 to vector<8x128xf32>
    %30 = arith.maximumf %28, %29 : vector<8x128xf32>
    %31 = arith.addf %24, %30 : vector<8x128xf32>
    %32 = vector.extract_strided_slice %7 {offsets = [3, 0, 0], sizes = [1, 8, 128], strides = [1, 1, 1]} : vector<8x8x128xf32> to vector<1x8x128xf32>
    %33 = vector.shape_cast %32 : vector<1x8x128xf32> to vector<8x128xf32>
    %cst_16 = arith.constant dense<0.000000e+00> : vector<8x128xf32>
    %34 = tpu.matmul %30, %8, %cst_16 {dimension_numbers = #tpu.dot_dimension_numbers<[1], [0], [0], [1], [0, 0, 1, 1], [], []>} : vector<8x128xf32>, vector<128x128xf32>, vector<8x128xf32> -> vector<8x128xf32>
    %35 = arith.addf %33, %34 : vector<8x128xf32>
    %cst_17 = arith.constant 0.000000e+00 : f32
    %36 = vector.broadcast %cst_17 : f32 to vector<8x128xf32>
    %37 = arith.maximumf %35, %36 : vector<8x128xf32>
    %38 = arith.addf %31, %37 : vector<8x128xf32>
    %39 = vector.extract_strided_slice %7 {offsets = [4, 0, 0], sizes = [1, 8, 128], strides = [1, 1, 1]} : vector<8x8x128xf32> to vector<1x8x128xf32>
    %40 = vector.shape_cast %39 : vector<1x8x128xf32> to vector<8x128xf32>
    %cst_18 = arith.constant dense<0.000000e+00> : vector<8x128xf32>
    %41 = tpu.matmul %37, %8, %cst_18 {dimension_numbers = #tpu.dot_dimension_numbers<[1], [0], [0], [1], [0, 0, 1, 1], [], []>} : vector<8x128xf32>, vector<128x128xf32>, vector<8x128xf32> -> vector<8x128xf32>
    %42 = arith.addf %40, %41 : vector<8x128xf32>
    %cst_19 = arith.constant 0.000000e+00 : f32
    %43 = vector.broadcast %cst_19 : f32 to vector<8x128xf32>
    %44 = arith.maximumf %42, %43 : vector<8x128xf32>
    %45 = arith.addf %38, %44 : vector<8x128xf32>
    %46 = vector.extract_strided_slice %7 {offsets = [5, 0, 0], sizes = [1, 8, 128], strides = [1, 1, 1]} : vector<8x8x128xf32> to vector<1x8x128xf32>
    %47 = vector.shape_cast %46 : vector<1x8x128xf32> to vector<8x128xf32>
    %cst_20 = arith.constant dense<0.000000e+00> : vector<8x128xf32>
    %48 = tpu.matmul %44, %8, %cst_20 {dimension_numbers = #tpu.dot_dimension_numbers<[1], [0], [0], [1], [0, 0, 1, 1], [], []>} : vector<8x128xf32>, vector<128x128xf32>, vector<8x128xf32> -> vector<8x128xf32>
    %49 = arith.addf %47, %48 : vector<8x128xf32>
    %cst_21 = arith.constant 0.000000e+00 : f32
    %50 = vector.broadcast %cst_21 : f32 to vector<8x128xf32>
    %51 = arith.maximumf %49, %50 : vector<8x128xf32>
    %52 = arith.addf %45, %51 : vector<8x128xf32>
    %53 = vector.extract_strided_slice %7 {offsets = [6, 0, 0], sizes = [1, 8, 128], strides = [1, 1, 1]} : vector<8x8x128xf32> to vector<1x8x128xf32>
    %54 = vector.shape_cast %53 : vector<1x8x128xf32> to vector<8x128xf32>
    %cst_22 = arith.constant dense<0.000000e+00> : vector<8x128xf32>
    %55 = tpu.matmul %51, %8, %cst_22 {dimension_numbers = #tpu.dot_dimension_numbers<[1], [0], [0], [1], [0, 0, 1, 1], [], []>} : vector<8x128xf32>, vector<128x128xf32>, vector<8x128xf32> -> vector<8x128xf32>
    %56 = arith.addf %54, %55 : vector<8x128xf32>
    %cst_23 = arith.constant 0.000000e+00 : f32
    %57 = vector.broadcast %cst_23 : f32 to vector<8x128xf32>
    %58 = arith.maximumf %56, %57 : vector<8x128xf32>
    %59 = arith.addf %52, %58 : vector<8x128xf32>
    %60 = vector.extract_strided_slice %7 {offsets = [7, 0, 0], sizes = [1, 8, 128], strides = [1, 1, 1]} : vector<8x8x128xf32> to vector<1x8x128xf32>
    %61 = vector.shape_cast %60 : vector<1x8x128xf32> to vector<8x128xf32>
    %cst_24 = arith.constant dense<0.000000e+00> : vector<8x128xf32>
    %62 = tpu.matmul %58, %8, %cst_24 {dimension_numbers = #tpu.dot_dimension_numbers<[1], [0], [0], [1], [0, 0, 1, 1], [], []>} : vector<8x128xf32>, vector<128x128xf32>, vector<8x128xf32> -> vector<8x128xf32>
    %63 = arith.addf %61, %62 : vector<8x128xf32>
    %cst_25 = arith.constant 0.000000e+00 : f32
    %64 = vector.broadcast %cst_25 : f32 to vector<8x128xf32>
    %65 = arith.maximumf %63, %64 : vector<8x128xf32>
    %66 = arith.addf %59, %65 : vector<8x128xf32>
    %cst_26 = arith.constant 1.250000e-01 : f32
    %67 = vector.broadcast %cst_26 : f32 to vector<8x128xf32>
    %68 = arith.mulf %66, %67 : vector<8x128xf32>
    %c0_27 = arith.constant 0 : index
    %c0_28 = arith.constant 0 : index
    %69 = vector.load %arg4[%c0_27, %c0_28] : memref<128x128xf32, #tpu.memory_space<vmem>>, vector<128x128xf32>
    %cst_29 = arith.constant dense<0.000000e+00> : vector<8x128xf32>
    %70 = tpu.matmul %68, %69, %cst_29 {dimension_numbers = #tpu.dot_dimension_numbers<[1], [0], [0], [1], [0, 0, 1, 1], [], []>} : vector<8x128xf32>, vector<128x128xf32>, vector<8x128xf32> -> vector<8x128xf32>
    %c0_30 = arith.constant 0 : index
    %c0_31 = arith.constant 0 : index
    %71 = vector.load %arg5[%c0_30, %c0_31] : memref<1x128xf32, #tpu.memory_space<vmem>>, vector<1x128xf32>
    %72 = vector.broadcast %71 : vector<1x128xf32> to vector<8x128xf32>
    %73 = arith.addf %70, %72 : vector<8x128xf32>
    %c0_32 = arith.constant 0 : index
    %c0_33 = arith.constant 0 : index
    %74 = vector.load %arg6[%c0_32, %c0_33] : memref<128x128xf32, #tpu.memory_space<vmem>>, vector<128x128xf32>
    %cst_34 = arith.constant dense<0.000000e+00> : vector<8x128xf32>
    %75 = tpu.matmul %73, %74, %cst_34 {dimension_numbers = #tpu.dot_dimension_numbers<[1], [0], [0], [1], [0, 0, 1, 1], [], []>} : vector<8x128xf32>, vector<128x128xf32>, vector<8x128xf32> -> vector<8x128xf32>
    %c0_35 = arith.constant 0 : index
    %c0_36 = arith.constant 0 : index
    %76 = vector.load %arg7[%c0_35, %c0_36] : memref<1x128xf32, #tpu.memory_space<vmem>>, vector<1x128xf32>
    %77 = vector.broadcast %76 : vector<1x128xf32> to vector<8x128xf32>
    %78 = arith.addf %75, %77 : vector<8x128xf32>
    %c0_37 = arith.constant 0 : index
    %c0_38 = arith.constant 0 : index
    %79 = vector.load %arg8[%c0_37, %c0_38] : memref<8x128xf32, #tpu.memory_space<vmem>>, vector<8x128xf32>
    tpu.vector_store %arg8[%c0_37, %c0_38], %78 {strides = array<i32>} : memref<8x128xf32, #tpu.memory_space<vmem>>, vector<8x128xf32>,
    return
  }
}

</mosaic_0001>

<bundles_post_ra>
// kernel: tpu_custom_call.1
= control target key start
LH: loop header
LB: loop body
LE: loop exit
PB: predicated region body
PF: predicated region fallthrough
CT: control target
= control target key end

     0   :  { %13 = vsyncpa [#allocation3], 0  ;;  %s2425_s0 = inlined_call_operand.hbm [shape: f32[8,8,128], index: 0, kind: input, shape index: {}]   ;;  %s2426_s1 = inlined_call_operand.hbm [shape: f32[128,128], index: 1, kind: input, shape index: {}]   ;;  %s2427_s2 = inlined_call_operand.vmem [shape: f32[1,128], index: 2, kind: input, shape index: {}]   ;;  %s2428_s3 = inlined_call_operand.hbm [shape: f32[128,128], index: 3, kind: input, shape index: {}]   ;;  %s2429_s4 = inlined_call_operand.hbm [shape: f32[128,128], index: 4, kind: input, shape index: {}]   ;;  %s2430_s5 = inlined_call_operand.vmem [shape: f32[1,128], index: 5, kind: input, shape index: {}]   ;;  %s2431_s6 = inlined_call_operand.hbm [shape: f32[128,128], index: 6, kind: input, shape index: {}]   ;;  %s2432_s7 = inlined_call_operand.vmem [shape: f32[1,128], index: 7, kind: input, shape index: {}]   ;;  %s2433_s8 = inlined_call_operand.hbm [shape: f32[8,128], index: 8, kind: output, shape index: {}]  }
   0x1   :  { %14 = vsyncpa [#allocation6], 0 }
   0x2   :  { %15 = vsyncpa [#allocation9], 0 }
   0x3   :  { %16 = vsyncpa [#allocation4], 0  ;;  %s2053_s27 = smov [#allocation5]   ;;  %s2054_s29 = smov [#allocation8]  }
   0x4   :  { %s34_s28 = sshll.u32 %s2053_s27, 4  ;;  %s60_s30 = sshll.u32 %s2054_s29, 4  ;;  %s35_s28 = int_to_ptr.vmem [resolvable:$true] %s34_s28  ;;  %s2109_s30 = int_to_ptr.vmem [resolvable:$true] %s60_s30 }
   0x5   :  { %s1913_s11 = scalar_lea.hbm %s2426_s1, 2048 }
   0x6   :  { %p1914_p0 = scmp.ne.s32.totalorder %s2426_s1, %s1913_s11  ;;  %p1917_p1 = scmp.lt.u32.totalorder %s1913_s11, %s2426_s1 }
   0x8   :  { %p1919_p2 = pnand %p1917_p1, %p1914_p0 }
   0xa   :  { %1922 = shalt.err (!%p1919_p2)
}
   0xb   :  { %s1923_s16 = scalar_lea.vmem %s35_s28, 2048  ;;  %p1928_p4 = scmp.lt.s32.totalorder %s35_s28, %s35_s28 }
   0xc   :  { %p1924_p3 = scmp.ne.s32.totalorder %s35_s28, %s1923_s16  ;;  %p1929_p5 = scmp.lt.s32.totalorder %s1923_s16, %s1923_s16 }
   0xe   :  { %p1930_p6 = por %p1929_p5, %p1928_p4 }
  0x10   :  { %p1931_p7 = pnand %p1930_p6, %p1924_p3 }
  0x12   :  { %1934 = shalt.err (!%p1931_p7)
}
  0x13   :  { %s2055_s17 = smov 128   ;;  %s2056_s18 = smov 8  }
  0x14   :  { %40 = dma.hbm_to_vmem [thread:$0]  %s2426_s1, 2048, %s35_s28, [#allocation6], %s2055_s17, %s2055_s17, %s2056_s18  }
  0x15   :  { %s1935_s23 = scalar_lea.hbm %s2429_s4, 2048 }
  0x16   :  { %p1936_p8 = scmp.ne.s32.totalorder %s2429_s4, %s1935_s23  ;;  %p1939_p9 = scmp.lt.u32.totalorder %s1935_s23, %s2429_s4 }
  0x18   :  { %p1941_p10 = pnand %p1939_p9, %p1936_p8 }
  0x1a   :  { %1944 = shalt.err (!%p1941_p10)
}
  0x1b   :  { %s1945_s29 = scalar_lea.vmem %s2109_s30, 2048  ;;  %p1950_p12 = scmp.lt.s32.totalorder %s2109_s30, %s2109_s30 }
  0x1c   :  { %p1946_p11 = scmp.ne.s32.totalorder %s2109_s30, %s1945_s29  ;;  %p1951_p13 = scmp.lt.s32.totalorder %s1945_s29, %s1945_s29 }
  0x1e   :  { %p1952_p0 = por %p1951_p13, %p1950_p12 }
  0x20   :  { %p1953_p1 = pnand %p1952_p0, %p1946_p11 }
  0x22   :  { %1956 = shalt.err (!%p1953_p1)
}
  0x23   :  { %66 = dma.hbm_to_vmem [thread:$0]  %s2429_s4, 2048, %s2109_s30, [#allocation9], %s2055_s17, %s2055_s17, %s2056_s18  }
  0x24   :  { %s2057_s9 = smov [#allocation2]   ;;  %s2058_s11 = smov [#allocation7]  }
  0x25   :  { %s22_s10 = sshll.u32 %s2057_s9, 4  ;;  %s48_s12 = sshll.u32 %s2058_s11, 4  ;;  %s23_s10 = int_to_ptr.vmem [resolvable:$true] %s22_s10  ;;  %s2146_s12 = int_to_ptr.vmem [resolvable:$true] %s48_s12 }
  0x26   :  { %s1957_s15 = scalar_lea.hbm %s2425_s0, 1024 }
  0x27   :  { %p1958_p2 = scmp.ne.s32.totalorder %s2425_s0, %s1957_s15  ;;  %p1961_p3 = scmp.lt.u32.totalorder %s1957_s15, %s2425_s0 }
  0x29   :  { %p1963_p4 = pnand %p1961_p3, %p1958_p2 }
  0x2b   :  { %1966 = shalt.err (!%p1963_p4)
}
  0x2c   :  { %s1967_s4 = scalar_lea.vmem %s23_s10, 1024  ;;  %p1972_p6 = scmp.lt.s32.totalorder %s23_s10, %s23_s10 }
  0x2d   :  { %p1968_p5 = scmp.ne.s32.totalorder %s23_s10, %s1967_s4  ;;  %p1973_p7 = scmp.lt.s32.totalorder %s1967_s4, %s1967_s4 }
  0x2f   :  { %p1974_p8 = por %p1973_p7, %p1972_p6 }
  0x31   :  { %p1975_p9 = pnand %p1974_p8, %p1968_p5 }
  0x33   :  { %1978 = shalt.err (!%p1975_p9)
}
  0x34   :  { %28 = dma.hbm_to_vmem [thread:$0]  %s2425_s0, 1024, %s23_s10, [#allocation3], %s2055_s17, %s2055_s17, %s2056_s18  }
  0x35   :  { %s1979_s25 = scalar_lea.hbm %s2428_s3, 2048 }
  0x36   :  { %p1980_p10 = scmp.ne.s32.totalorder %s2428_s3, %s1979_s25  ;;  %p1983_p11 = scmp.lt.u32.totalorder %s1979_s25, %s2428_s3 }
  0x38   :  { %p1985_p12 = pnand %p1983_p11, %p1980_p10 }
  0x3a   :  { %1988 = shalt.err (!%p1985_p12)
}
  0x3b   :  { %s1989_s28 = scalar_lea.vmem %s2146_s12, 2048  ;;  %p1994_p0 = scmp.lt.s32.totalorder %s2146_s12, %s2146_s12 }
  0x3c   :  { %p1990_p13 = scmp.ne.s32.totalorder %s2146_s12, %s1989_s28  ;;  %p1995_p1 = scmp.lt.s32.totalorder %s1989_s28, %s1989_s28 }
  0x3e   :  { %p1996_p2 = por %p1995_p1, %p1994_p0 }
  0x40   :  { %p1997_p3 = pnand %p1996_p2, %p1990_p13 }
  0x42   :  { %2000 = shalt.err (!%p1997_p3)
}
  0x43   :  { %54 = dma.hbm_to_vmem [thread:$0]  %s2428_s3, 2048, %s2146_s12, [#allocation6], %s2055_s17, %s2055_s17, %s2056_s18  }
  0x44   :  { %s2059_s10 = smov [#allocation10]   ;;  %s2001_s15 = scalar_lea.hbm %s2431_s6, 2048 }
  0x45   :  { %s74_s11 = sshll.u32 %s2059_s10, 4  ;;  %p2002_p4 = scmp.ne.s32.totalorder %s2431_s6, %s2001_s15  ;;  %s75_s11 = int_to_ptr.vmem [resolvable:$true] %s74_s11 }
  0x46   :  { %p2005_p5 = scmp.lt.u32.totalorder %s2001_s15, %s2431_s6 }
  0x48   :  { %p2007_p6 = pnand %p2005_p5, %p2002_p4 }
  0x4a   :  { %2010 = shalt.err (!%p2007_p6)
}
  0x4b   :  { %s2011_s4 = scalar_lea.vmem %s75_s11, 2048  ;;  %p2016_p8 = scmp.lt.s32.totalorder %s75_s11, %s75_s11 }
  0x4c   :  { %p2012_p7 = scmp.ne.s32.totalorder %s75_s11, %s2011_s4  ;;  %p2017_p9 = scmp.lt.s32.totalorder %s2011_s4, %s2011_s4 }
  0x4e   :  { %p2018_p10 = por %p2017_p9, %p2016_p8 }
  0x50   :  { %p2019_p11 = pnand %p2018_p10, %p2012_p7 }
  0x52   :  { %2022 = shalt.err (!%p2019_p11)
}
  0x53   :  { %80 = dma.hbm_to_vmem [thread:$0]  %s2431_s6, 2048, %s75_s11, [#allocation9], %s2055_s17, %s2055_s17, %s2056_s18  }
  0x54   :  { %2045 = dma.done.wait [#allocation3], 1024  }
  0x55   :  { %2046 = vsyncadd [#allocation3], 4294966272 }
  0x56   :  { %2047 = dma.done.wait [#allocation6], 4096  }
  0x57   :  { %2048 = vsyncadd [#allocation6], 4294963200 }
  0x58   :  { %2049 = dma.done.wait [#allocation9], 4096  }
  0x59   :  { %2050 = vsyncadd [#allocation9], 4294963200  ;;  %v2060_v0 = vmov 0.0|0.0   ;;  %vm2061_vm0 = vmmov 0   ;;  %v2062_v1 = vmov 0.0   ;;  %v106_v2 = vld [vmem:[#allocation5] sm:$0xff] }
  0x5a   :  { %1662 = vmatprep.subr.bf16.mxu1 %v2060_v0  ;;  %1312 = vmatprep.mubr.msk.f32.mxu1 %vm2061_vm0, %v2062_v1  ;;  %v107_v3 = vld [vmem:[#allocation5 + $0x8] sm:$0xff]  ;;  %v234_v4 = vld [vmem:[#allocation7] sm:$0xff]  ;;  %v108_v7 = vld [vmem:[#allocation5 + $0x10] sm:$0xff]  ;;  %s2063_s23 = smov [#allocation11]  }
  0x5b   :  { %v1630_v5 = vpack.c.bf16 %v107_v3, %v106_v2  ;;  %v235_v6 = vld [vmem:[#allocation7 + $0x8] sm:$0xff]  ;;  %v109_v8 = vld [vmem:[#allocation5 + $0x18] sm:$0xff]  ;;  %v236_v11 = vld [vmem:[#allocation7 + $0x10] sm:$0xff]  ;;  %s1028_s24 = sshll.u32 %s2063_s23, 4  ;;  %s1029_s24 = int_to_ptr.vmem [resolvable:$true] %s1028_s24 }
  0x5c   :  { %v2201_v9 = vpack.c.bf16 %v235_v6, %v234_v4  ;;  %v1634_v10 = vpack.c.bf16 %v109_v8, %v108_v7  ;;  %v237_v12 = vld [vmem:[#allocation7 + $0x18] sm:$0xff]  ;;  %v110_v13 = vld [vmem:[#allocation5 + $0x20] sm:$0xff]  ;;  %v111_v14 = vld [vmem:[#allocation5 + $0x28] sm:$0xff]  ;;  %s2023_s25 = scalar_lea.vmem %s1029_s24, 128  ;;  %p2028_p13 = scmp.lt.s32.totalorder %s1029_s24, %s1029_s24 }
  0x5d   :  { %1631 = vmatprep.subr.bf16.mxu0 %v1630_v5  ;;  %v2204_v15 = vpack.c.bf16 %v237_v12, %v236_v11  ;;  %v1638_v16 = vpack.c.bf16 %v111_v14, %v110_v13  ;;  %v238_v17 = vld [vmem:[#allocation7 + $0x20] sm:$0xff]  ;;  %v239_v18 = vld [vmem:[#allocation7 + $0x28] sm:$0xff]  ;;  %v112_v19 = vld [vmem:[#allocation5 + $0x30] sm:$0xff]  ;;  %p2024_p12 = scmp.ne.s32.totalorder %s1029_s24, %s2023_s25  ;;  %p2029_p0 = scmp.lt.s32.totalorder %s2023_s25, %s2023_s25 }
  0x5e   :  { %1633 = vmatpush3.bf16.msra.mxu0 %v1630_v5  ;;  %1664 = vmatpush3.bf16.msra.mxu1 %v2201_v9  ;;  %v113_v20 = vld [vmem:[#allocation5 + $0x38] sm:$0xff]  ;;  %v2208_v21 = vpack.c.bf16 %v239_v18, %v238_v17  ;;  %v240_v23 = vld [vmem:[#allocation7 + $0x30] sm:$0xff]  ;;  %v114_v25 = vld [vmem:[#allocation5 + $0x40] sm:$0xff] }
  0x5f   :  { %1635 = vmatprep.subr.bf16.mxu0 %v1634_v10  ;;  %1665 = vmatprep.subr.bf16.mxu1 %v2060_v0  ;;  %v1642_v22 = vpack.c.bf16 %v113_v20, %v112_v19  ;;  %v241_v24 = vld [vmem:[#allocation7 + $0x38] sm:$0xff]  ;;  %v115_v26 = vld [vmem:[#allocation5 + $0x48] sm:$0xff]  ;;  %v98_v27 = vld [vmem:[#allocation2] sm:$0xff]  ;;  %p2030_p1 = por %p2029_p0, %p2028_p13 }
  0x60   :  { %1268 = vmatprep.mubr.f32.mxu0 %v98_v27  ;;  %v2212_v28 = vpack.c.bf16 %v241_v24, %v240_v23  ;;  %v1646_v29 = vpack.c.bf16 %v115_v26, %v114_v25  ;;  %v242_v30 = vld [vmem:[#allocation7 + $0x40] sm:$0xff]  ;;  %v243_v31 = vld [vmem:[#allocation7 + $0x48] sm:$0xff]  ;;  %v116_v32 = vld [vmem:[#allocation5 + $0x50] sm:$0xff] }
  0x61   :  { %v117_v33 = vld [vmem:[#allocation5 + $0x58] sm:$0xff]  ;;  %v2216_v34 = vpack.c.bf16 %v243_v31, %v242_v30  ;;  %v244_v36 = vld [vmem:[#allocation7 + $0x50] sm:$0xff]  ;;  %v118_v38 = vld [vmem:[#allocation5 + $0x60] sm:$0xff]  ;;  %p2031_p2 = pnand %p2030_p1, %p2024_p12 }
  0x62   :  { %1637 = vmatpush3.bf16.msra.mxu0 %v1634_v10  ;;  %1667 = vmatpush3.bf16.msra.mxu1 %v2204_v15  ;;  %v1650_v35 = vpack.c.bf16 %v117_v33, %v116_v32  ;;  %v245_v37 = vld [vmem:[#allocation7 + $0x58] sm:$0xff]  ;;  %v119_v39 = vld [vmem:[#allocation5 + $0x68] sm:$0xff]  ;;  %v246_v42 = vld [vmem:[#allocation7 + $0x60] sm:$0xff] }
  0x63   :  { %1639 = vmatprep.subr.bf16.mxu0 %v1638_v16  ;;  %1668 = vmatprep.subr.bf16.mxu1 %v2060_v0  ;;  %v2220_v40 = vpack.c.bf16 %v245_v37, %v244_v36  ;;  %v1654_v41 = vpack.c.bf16 %v119_v39, %v118_v38  ;;  %v247_v43 = vld [vmem:[#allocation7 + $0x68] sm:$0xff]  ;;  %v120_v44 = vld [vmem:[#allocation5 + $0x70] sm:$0xff]  ;;  %v121_v45 = vld [vmem:[#allocation5 + $0x78] sm:$0xff] }
  0x64   :  { %v2224_v46 = vpack.c.bf16 %v247_v43, %v246_v42  ;;  %v1658_v47 = vpack.c.bf16 %v121_v45, %v120_v44  ;;  %v248_v48 = vld [vmem:[#allocation7 + $0x70] sm:$0xff]  ;;  %v249_v49 = vld [vmem:[#allocation7 + $0x78] sm:$0xff]  ;;  %v99_v51 = vld [vmem:[#allocation2 + $0x8] sm:$0xff] }
  0x65   :  { %v2228_v50 = vpack.c.bf16 %v249_v49, %v248_v48  ;;  %v100_v52 = vld [vmem:[#allocation2 + $0x10] sm:$0xff]  ;;  %v101_v53 = vld [vmem:[#allocation2 + $0x18] sm:$0xff]  ;;  %v102_v54 = vld [vmem:[#allocation2 + $0x20] sm:$0xff] }
  0x66   :  { %1641 = vmatpush3.bf16.msra.mxu0 %v1638_v16  ;;  %1670 = vmatpush3.bf16.msra.mxu1 %v2208_v21  ;;  %v103_v55 = vld [vmem:[#allocation2 + $0x28] sm:$0xff]  ;;  %v104_v56 = vld [vmem:[#allocation2 + $0x30] sm:$0xff]  ;;  %v105_v57 = vld [vmem:[#allocation2 + $0x38] sm:$0xff] }
  0x67   :  { %1643 = vmatprep.subr.bf16.mxu0 %v1642_v22  ;;  %1671 = vmatprep.subr.bf16.mxu1 %v2060_v0  ;;  %v2274_v58 = vld [vmem:[%s2427_s2] ss:$0 sm:$0xff]  ;;  %v837_v42 = vld [vmem:[#allocation8 + $0x10] sm:$0xff]  ;;  %v838_v44 = vld [vmem:[#allocation8 + $0x18] sm:$0xff] }
  0x68   :  { %v1858_v45 = vpack.c.bf16 %v838_v44, %v837_v42  ;;  %v841_v49 = vld [vmem:[#allocation8 + $0x30] sm:$0xff] }
  0x6a   :  { %1645 = vmatpush3.bf16.msra.mxu0 %v1642_v22  ;;  %1673 = vmatpush3.bf16.msra.mxu1 %v2212_v28 }
  0x6b   :  { %1647 = vmatprep.subr.bf16.mxu0 %v1646_v29  ;;  %1674 = vmatprep.subr.bf16.mxu1 %v2060_v0 }
  0x6e   :  { %1649 = vmatpush3.bf16.msra.mxu0 %v1646_v29  ;;  %1676 = vmatpush3.bf16.msra.mxu1 %v2216_v34 }
  0x6f   :  { %1651 = vmatprep.subr.bf16.mxu0 %v1650_v35  ;;  %1677 = vmatprep.subr.bf16.mxu1 %v2060_v0 }
  0x72   :  { %1653 = vmatpush3.bf16.msra.mxu0 %v1650_v35  ;;  %1679 = vmatpush3.bf16.msra.mxu1 %v2220_v40 }
  0x73   :  { %1655 = vmatprep.subr.bf16.mxu0 %v1654_v41  ;;  %1680 = vmatprep.subr.bf16.mxu1 %v2060_v0 }
  0x76   :  { %1657 = vmatpush3.bf16.msra.mxu0 %v1654_v41  ;;  %1682 = vmatpush3.bf16.msra.mxu1 %v2224_v46  ;;  %v836_v41 = vld [vmem:[#allocation8 + $0x8] sm:$0xff] }
  0x77   :  { %1659 = vmatprep.subr.bf16.mxu0 %v1658_v47  ;;  %1683 = vmatprep.subr.bf16.mxu1 %v2060_v0 }
  0x7a   :  { %1661 = vmatpush3.bf16.msra.mxu0 %v1658_v47  ;;  %1685 = vmatpush3.bf16.msra.mxu1 %v2228_v50  ;;  %v840_v47 = vld [vmem:[#allocation8 + $0x28] sm:$0xff] }
  0x7b   :  { %1686 = vmatprep.subr.bf16.mxu0 %v2060_v0  ;;  %1710 = vmatprep.subr.bf16.mxu1 %v2060_v0 }
  0x7d   :  { %1269 = vmatmul.mubr.f32.vlgmr.msra.gmra.mrb[0].mxu0 %v99_v51  ;;  %1313 = vmatmul.mubr.f32.vlgmr.msra.gmra.mrb[0].mxu1 %v2062_v1 }
  0x7e   :  { %1688 = vmatpush3.bf16.msra.mxu0 %v2201_v9  ;;  %1271 = vmatprep.mubr.f32.mxu0 %v100_v52  ;;  %v843_v52 = vld [vmem:[#allocation8 + $0x40] sm:$0xff] }
  0x7f   :  { %1689 = vmatprep.subr.bf16.mxu0 %v2060_v0  ;;  %1712 = vmatpush3.bf16.msra.mxu1 %v2201_v9 }
  0x80   :  { %1713 = vmatprep.subr.bf16.mxu1 %v2060_v0  ;;  %1382 = vmatprep.mubr.msk.f32.mxu1 %vm2061_vm0, %v2062_v1 }
  0x81   :  { %1272 = vmatmul.mubr.f32.gmra.mrb[2].mxu0 %v101_v53  ;;  %v844_v53 = vld [vmem:[#allocation8 + $0x48] sm:$0xff] }
  0x82   :  { %1691 = vmatpush3.bf16.msra.mxu0 %v2204_v15  ;;  %1274 = vmatprep.mubr.f32.mxu0 %v102_v54  ;;  %v1867_v54 = vpack.c.bf16 %v844_v53, %v843_v52 }
  0x83   :  { %1692 = vmatprep.subr.bf16.mxu0 %v2060_v0  ;;  %1715 = vmatpush3.bf16.msra.mxu1 %v2204_v15 }
  0x84   :  { %1716 = vmatprep.subr.bf16.mxu1 %v2060_v0 }
  0x85   :  { %1275 = vmatmul.mubr.f32.gmra.mrb[4].mxu0 %v103_v55  ;;  %v845_v55 = vld [vmem:[#allocation8 + $0x50] sm:$0xff] }
  0x86   :  { %1694 = vmatpush3.bf16.msra.mxu0 %v2208_v21  ;;  %1277 = vmatprep.mubr.f32.mxu0 %v104_v56  ;;  %v846_v56 = vld [vmem:[#allocation8 + $0x58] sm:$0xff] }
  0x87   :  { %1695 = vmatprep.subr.bf16.mxu0 %v2060_v0  ;;  %1718 = vmatpush3.bf16.msra.mxu1 %v2208_v21 }
  0x88   :  { %1719 = vmatprep.subr.bf16.mxu1 %v2060_v0 }
  0x89   :  { %1278 = vmatmul.mubr.f32.gmra.mrb[6].mxu0 %v105_v57  ;;  %v1870_v57 = vpack.c.bf16 %v846_v56, %v845_v55 }
  0x8a   :  { %1697 = vmatpush3.bf16.msra.mxu0 %v2212_v28  ;;  %1347 = vmatprep.mubr.msk.f32.mxu0 %vm2061_vm0, %v2062_v1 }
  0x8b   :  { %1698 = vmatprep.subr.bf16.mxu0 %v2060_v0  ;;  %1721 = vmatpush3.bf16.msra.mxu1 %v2212_v28 }
  0x8c   :  { %1722 = vmatprep.subr.bf16.mxu1 %v2060_v0 }
  0x8e   :  { %1700 = vmatpush3.bf16.msra.mxu0 %v2216_v34 }
  0x8f   :  { %1701 = vmatprep.subr.bf16.mxu0 %v2060_v0  ;;  %1724 = vmatpush3.bf16.msra.mxu1 %v2216_v34 }
  0x90   :  { %1725 = vmatprep.subr.bf16.mxu1 %v2060_v0 }
  0x92   :  { %1703 = vmatpush3.bf16.msra.mxu0 %v2220_v40 }
  0x93   :  { %1704 = vmatprep.subr.bf16.mxu0 %v2060_v0  ;;  %1727 = vmatpush3.bf16.msra.mxu1 %v2220_v40 }
  0x94   :  { %1728 = vmatprep.subr.bf16.mxu1 %v2060_v0 }
  0x96   :  { %1706 = vmatpush3.bf16.msra.mxu0 %v2224_v46 }
  0x97   :  { %1707 = vmatprep.subr.bf16.mxu0 %v2060_v0  ;;  %1730 = vmatpush3.bf16.msra.mxu1 %v2224_v46 }
  0x98   :  { %1731 = vmatprep.subr.bf16.mxu1 %v2060_v0 }
  0x9a   :  { %1709 = vmatpush3.bf16.msra.mxu0 %v2228_v50 }
  0x9b   :  { %1733 = vmatpush3.bf16.msra.mxu1 %v2228_v50  ;;  %1734 = vmatprep.subr.bf16.mxu0 %v2060_v0 }
  0x9c   :  { %1758 = vmatprep.subr.bf16.mxu1 %v2060_v0 }
 0x150   :  { %v1270_v59 = vpop.f32.mrb[0].mxu0  ;;  %v316_v60 = vpop.f32.mrb[0].mxu1 }
 0x151   :  { %v195_v61 = vpop.f32.mrb[1].mxu0  ;;  %v1314_v62 = vpop.f32.mrb[1].mxu1  ;;  %v201_v11 = vadd.f32 %v1270_v59, %v2274_v58 }
 0x152   :  { %v196_v63 = vadd.f32 %v2274_v58, %v195_v61 }
 0x154   :  { %v320_v2 = vadd.f32 %v316_v60, %v196_v63  ;;  %v2277_v3 = vpop.f32.mrb[2].mxu0 }
 0x155   :  { %v205_v4 = vpop.f32.mrb[3].mxu0  ;;  %v211_v25 = vadd.f32 %v2277_v3, %v2274_v58  ;;  %v847_v3 = vld [vmem:[#allocation8 + $0x60] sm:$0xff] }
 0x156   :  { %v321_v5 = vmax.f32 %v320_v2, 0.0  ;;  %v206_v17 = vadd.f32 %v2274_v58, %v205_v4  ;;  %v848_v4 = vld [vmem:[#allocation8 + $0x68] sm:$0xff] }
 0x158   :  { %1348 = vmatmul.mubr.f32.vlgmr.msra.gmra.mrb[8].mxu0 %v321_v5  ;;  %v2279_v6 = vpop.f32.mrb[4].mxu0 }
 0x159   :  { %v2281_v7 = vpop.f32.mrb[5].mxu0  ;;  %1736 = vmatpush3.bf16.msra.mxu0 %v2201_v9  ;;  %1417 = vmatprep.mubr.msk.f32.mxu0 %vm2061_vm0, %v2062_v1 }
 0x15a   :  { %1737 = vmatprep.subr.bf16.mxu0 %v2060_v0  ;;  %v216_v32 = vadd.f32 %v2274_v58, %v2281_v7  ;;  %v850_v7 = vld [vmem:[#allocation8 + $0x78] sm:$0xff] }
 0x15c   :  { %v2301_v8 = vpop.f32.mrb[6].mxu0 }
 0x15d   :  { %1739 = vmatpush3.bf16.msra.mxu0 %v2204_v15  ;;  %v2303_v10 = vpop.f32.mrb[7].mxu0 }
 0x15e   :  { %1740 = vmatprep.subr.bf16.mxu0 %v2060_v0  ;;  %v226_v59 = vadd.f32 %v2274_v58, %v2303_v10  ;;  %v928_v10 = vld [vmem:[#allocation10] sm:$0xff] }
 0x161   :  { %1742 = vmatpush3.bf16.msra.mxu0 %v2208_v21 }
 0x162   :  { %1743 = vmatprep.subr.bf16.mxu0 %v2060_v0 }
 0x165   :  { %1745 = vmatpush3.bf16.msra.mxu0 %v2212_v28 }
 0x166   :  { %1746 = vmatprep.subr.bf16.mxu0 %v2060_v0 }
 0x169   :  { %1748 = vmatpush3.bf16.msra.mxu0 %v2216_v34 }
 0x16a   :  { %1749 = vmatprep.subr.bf16.mxu0 %v2060_v0 }
 0x16d   :  { %1751 = vmatpush3.bf16.msra.mxu0 %v2220_v40 }
 0x16e   :  { %1752 = vmatprep.subr.bf16.mxu0 %v2060_v0 }
 0x171   :  { %1754 = vmatpush3.bf16.msra.mxu0 %v2224_v46 }
 0x172   :  { %1755 = vmatprep.subr.bf16.mxu0 %v2060_v0 }
 0x175   :  { %1757 = vmatpush3.bf16.msra.mxu0 %v2228_v50 }
 0x176   :  { %1782 = vmatprep.subr.bf16.mxu0 %v2060_v0 }
 0x22b   :  { %v389_v12 = vpop.f32.mrb[8].mxu0 }
 0x22c   :  { %v393_v13 = vadd.f32 %v389_v12, %v201_v11  ;;  %v1349_v14 = vpop.f32.mrb[9].mxu0  ;;  %v929_v12 = vld [vmem:[#allocation10 + $0x8] sm:$0xff] }
 0x22d   :  { %v1879_v14 = vpack.c.bf16 %v929_v12, %v928_v10 }
 0x22e   :  { %v394_v16 = vmax.f32 %v393_v13, 0.0  ;;  %v930_v13 = vld [vmem:[#allocation10 + $0x10] sm:$0xff] }
 0x230   :  { %1383 = vmatmul.mubr.f32.vlgmr.msra.gmra.mrb[2].mxu1 %v394_v16  ;;  %v395_v22 = vadd.f32 %v394_v16, %v321_v5  ;;  %v1873_v5 = vpack.c.bf16 %v848_v4, %v847_v3  ;;  %v931_v16 = vld [vmem:[#allocation10 + $0x18] sm:$0xff] }
 0x231   :  { %1760 = vmatpush3.bf16.msra.mxu1 %v2201_v9  ;;  %1452 = vmatprep.mubr.msk.f32.mxu1 %vm2061_vm0, %v2062_v1 }
 0x232   :  { %1761 = vmatprep.subr.bf16.mxu1 %v2060_v0 }
 0x235   :  { %1763 = vmatpush3.bf16.msra.mxu1 %v2204_v15 }
 0x236   :  { %1764 = vmatprep.subr.bf16.mxu1 %v2060_v0 }
 0x239   :  { %1766 = vmatpush3.bf16.msra.mxu1 %v2208_v21 }
 0x23a   :  { %1767 = vmatprep.subr.bf16.mxu1 %v2060_v0 }
 0x23d   :  { %1769 = vmatpush3.bf16.msra.mxu1 %v2212_v28 }
 0x23e   :  { %1770 = vmatprep.subr.bf16.mxu1 %v2060_v0 }
 0x241   :  { %1772 = vmatpush3.bf16.msra.mxu1 %v2216_v34 }
 0x242   :  { %1773 = vmatprep.subr.bf16.mxu1 %v2060_v0 }
 0x245   :  { %1775 = vmatpush3.bf16.msra.mxu1 %v2220_v40 }
 0x246   :  { %1776 = vmatprep.subr.bf16.mxu1 %v2060_v0 }
 0x249   :  { %1778 = vmatpush3.bf16.msra.mxu1 %v2224_v46 }
 0x24a   :  { %1779 = vmatprep.subr.bf16.mxu1 %v2060_v0 }
 0x24d   :  { %1781 = vmatpush3.bf16.msra.mxu1 %v2228_v50 }
 0x24e   :  { %1806 = vmatprep.subr.bf16.mxu1 %v2060_v0 }
 0x303   :  { %v462_v18 = vpop.f32.mrb[2].mxu1 }
 0x304   :  { %v466_v19 = vadd.f32 %v462_v18, %v206_v17  ;;  %v1384_v20 = vpop.f32.mrb[3].mxu1  ;;  %v1882_v17 = vpack.c.bf16 %v931_v16, %v930_v13  ;;  %v933_v18 = vld [vmem:[#allocation10 + $0x28] sm:$0xff] }
 0x305   :  { %v934_v20 = vld [vmem:[#allocation10 + $0x30] sm:$0xff] }
 0x306   :  { %v467_v23 = vmax.f32 %v466_v19, 0.0 }
 0x308   :  { %v468_v24 = vadd.f32 %v467_v23, %v395_v22  ;;  %1418 = vmatmul.mubr.f32.vlgmr.msra.gmra.mrb[10].mxu0 %v467_v23  ;;  %v935_v22 = vld [vmem:[#allocation10 + $0x38] sm:$0xff] }
 0x309   :  { %1784 = vmatpush3.bf16.msra.mxu0 %v2201_v9  ;;  %1487 = vmatprep.mubr.msk.f32.mxu0 %vm2061_vm0, %v2062_v1  ;;  %v1888_v23 = vpack.c.bf16 %v935_v22, %v934_v20 }
 0x30a   :  { %1785 = vmatprep.subr.bf16.mxu0 %v2060_v0 }
 0x30d   :  { %1787 = vmatpush3.bf16.msra.mxu0 %v2204_v15 }
 0x30e   :  { %1788 = vmatprep.subr.bf16.mxu0 %v2060_v0 }
 0x311   :  { %1790 = vmatpush3.bf16.msra.mxu0 %v2208_v21 }
 0x312   :  { %1791 = vmatprep.subr.bf16.mxu0 %v2060_v0 }
 0x315   :  { %1793 = vmatpush3.bf16.msra.mxu0 %v2212_v28 }
 0x316   :  { %1794 = vmatprep.subr.bf16.mxu0 %v2060_v0 }
 0x319   :  { %1796 = vmatpush3.bf16.msra.mxu0 %v2216_v34 }
 0x31a   :  { %1797 = vmatprep.subr.bf16.mxu0 %v2060_v0 }
 0x31d   :  { %1799 = vmatpush3.bf16.msra.mxu0 %v2220_v40 }
 0x31e   :  { %1800 = vmatprep.subr.bf16.mxu0 %v2060_v0 }
 0x321   :  { %1802 = vmatpush3.bf16.msra.mxu0 %v2224_v46 }
 0x322   :  { %1803 = vmatprep.subr.bf16.mxu0 %v2060_v0 }
 0x325   :  { %1805 = vmatpush3.bf16.msra.mxu0 %v2228_v50 }
 0x326   :  { %1830 = vmatprep.subr.bf16.mxu0 %v2060_v0 }
 0x3db   :  { %v535_v26 = vpop.f32.mrb[10].mxu0 }
 0x3dc   :  { %v539_v27 = vadd.f32 %v535_v26, %v211_v25  ;;  %v1419_v29 = vpop.f32.mrb[11].mxu0  ;;  %v937_v25 = vld [vmem:[#allocation10 + $0x48] sm:$0xff] }
 0x3dd   :  { %v939_v29 = vld [vmem:[#allocation10 + $0x58] sm:$0xff] }
 0x3de   :  { %v540_v30 = vmax.f32 %v539_v27, 0.0  ;;  %v938_v27 = vld [vmem:[#allocation10 + $0x50] sm:$0xff] }
 0x3e0   :  { %v541_v31 = vadd.f32 %v540_v30, %v468_v24  ;;  %1453 = vmatmul.mubr.f32.vlgmr.msra.gmra.mrb[4].mxu1 %v540_v30  ;;  %v936_v24 = vld [vmem:[#allocation10 + $0x40] sm:$0xff]  ;;  %v1894_v30 = vpack.c.bf16 %v939_v29, %v938_v27 }
 0x3e1   :  { %1808 = vmatpush3.bf16.msra.mxu1 %v2201_v9  ;;  %1522 = vmatprep.mubr.msk.f32.mxu1 %vm2061_vm0, %v2062_v1  ;;  %v1891_v26 = vpack.c.bf16 %v937_v25, %v936_v24 }
 0x3e2   :  { %1809 = vmatprep.subr.bf16.mxu1 %v2060_v0 }
 0x3e5   :  { %1811 = vmatpush3.bf16.msra.mxu1 %v2204_v15 }
 0x3e6   :  { %1812 = vmatprep.subr.bf16.mxu1 %v2060_v0 }
 0x3e9   :  { %1814 = vmatpush3.bf16.msra.mxu1 %v2208_v21 }
 0x3ea   :  { %1815 = vmatprep.subr.bf16.mxu1 %v2060_v0 }
 0x3ed   :  { %1817 = vmatpush3.bf16.msra.mxu1 %v2212_v28 }
 0x3ee   :  { %1818 = vmatprep.subr.bf16.mxu1 %v2060_v0 }
 0x3f1   :  { %1820 = vmatpush3.bf16.msra.mxu1 %v2216_v34 }
 0x3f2   :  { %1821 = vmatprep.subr.bf16.mxu1 %v2060_v0 }
 0x3f5   :  { %1823 = vmatpush3.bf16.msra.mxu1 %v2220_v40 }
 0x3f6   :  { %1824 = vmatprep.subr.bf16.mxu1 %v2060_v0 }
 0x3f9   :  { %1826 = vmatpush3.bf16.msra.mxu1 %v2224_v46 }
 0x3fa   :  { %1827 = vmatprep.subr.bf16.mxu1 %v2060_v0 }
 0x3fd   :  { %1829 = vmatpush3.bf16.msra.mxu1 %v2228_v50 }
 0x3fe   :  { %1854 = vmatprep.subr.bf16.mxu1 %v2060_v0 }
 0x4b3   :  { %v608_v33 = vpop.f32.mrb[4].mxu1 }
 0x4b4   :  { %v612_v35 = vadd.f32 %v608_v33, %v216_v32  ;;  %v1454_v36 = vpop.f32.mrb[5].mxu1  ;;  %v941_v32 = vld [vmem:[#allocation10 + $0x68] sm:$0xff] }
 0x4b6   :  { %v613_v37 = vmax.f32 %v612_v35, 0.0  ;;  %v231_v35 = vadd.f32 %v2301_v8, %v2274_v58 }
 0x4b8   :  { %v614_v38 = vadd.f32 %v613_v37, %v541_v31  ;;  %1488 = vmatmul.mubr.f32.vlgmr.msra.gmra.mrb[12].mxu0 %v613_v37  ;;  %v940_v31 = vld [vmem:[#allocation10 + $0x60] sm:$0xff] }
 0x4b9   :  { %1832 = vmatpush3.bf16.msra.mxu0 %v2201_v9  ;;  %1557 = vmatprep.mubr.msk.f32.mxu0 %vm2061_vm0, %v2062_v1  ;;  %v221_v9 = vadd.f32 %v2279_v6, %v2274_v58  ;;  %v849_v6 = vld [vmem:[#allocation8 + $0x70] sm:$0xff]  ;;  %v1897_v33 = vpack.c.bf16 %v941_v32, %v940_v31  ;;  %v1041_v58 = vld [vmem:[%s2432_s7] ss:$0 sm:$0xff] }
 0x4ba   :  { %1833 = vmatprep.subr.bf16.mxu0 %v2060_v0  ;;  %v1876_v11 = vpack.c.bf16 %v850_v7, %v849_v6 }
 0x4bd   :  { %1835 = vmatpush3.bf16.msra.mxu0 %v2204_v15 }
 0x4be   :  { %1836 = vmatprep.subr.bf16.mxu0 %v2060_v0 }
 0x4c1   :  { %1838 = vmatpush3.bf16.msra.mxu0 %v2208_v21 }
 0x4c2   :  { %1839 = vmatprep.subr.bf16.mxu0 %v2060_v0 }
 0x4c5   :  { %1841 = vmatpush3.bf16.msra.mxu0 %v2212_v28 }
 0x4c6   :  { %1842 = vmatprep.subr.bf16.mxu0 %v2060_v0 }
 0x4c9   :  { %1844 = vmatpush3.bf16.msra.mxu0 %v2216_v34 }
 0x4ca   :  { %1845 = vmatprep.subr.bf16.mxu0 %v2060_v0 }
 0x4cd   :  { %1847 = vmatpush3.bf16.msra.mxu0 %v2220_v40  ;;  %v835_v40 = vld [vmem:[#allocation8] sm:$0xff] }
 0x4ce   :  { %1848 = vmatprep.subr.bf16.mxu0 %v2060_v0  ;;  %v1855_v43 = vpack.c.bf16 %v836_v41, %v835_v40  ;;  %v1040_v40 = vld [vmem:[%s2430_s5] ss:$0 sm:$0xff] }
 0x4d1   :  { %1850 = vmatpush3.bf16.msra.mxu0 %v2224_v46  ;;  %v839_v46 = vld [vmem:[#allocation8 + $0x20] sm:$0xff] }
 0x4d2   :  { %1851 = vmatprep.subr.bf16.mxu0 %v2060_v0  ;;  %v1861_v48 = vpack.c.bf16 %v840_v47, %v839_v46 }
 0x4d5   :  { %1853 = vmatpush3.bf16.msra.mxu0 %v2228_v50  ;;  %v842_v50 = vld [vmem:[#allocation8 + $0x38] sm:$0xff] }
 0x4d6   :  { %1878 = vmatprep.subr.bf16.mxu0 %v2060_v0  ;;  %v1864_v51 = vpack.c.bf16 %v842_v50, %v841_v49 }
 0x58b   :  { %v681_v15 = vpop.f32.mrb[12].mxu0 }
 0x58c   :  { %v685_v21 = vadd.f32 %v681_v15, %v221_v9  ;;  %v1489_v28 = vpop.f32.mrb[13].mxu0 }
 0x58d   :  { %v942_v28 = vld [vmem:[#allocation10 + $0x70] sm:$0xff] }
 0x58e   :  { %v686_v34 = vmax.f32 %v685_v21, 0.0 }
 0x590   :  { %v687_v39 = vadd.f32 %v686_v34, %v614_v38  ;;  %1523 = vmatmul.mubr.f32.vlgmr.msra.gmra.mrb[6].mxu1 %v686_v34  ;;  %v943_v34 = vld [vmem:[#allocation10 + $0x78] sm:$0xff] }
 0x591   :  { %1592 = vmatprep.mubr.msk.f32.mxu1 %vm2061_vm0, %v2062_v1  ;;  %1856 = vmatpush3.bf16.msra.mxu1 %v1855_v43 }
 0x592   :  { %1857 = vmatprep.subr.bf16.mxu1 %v2060_v0 }
 0x595   :  { %1859 = vmatpush3.bf16.msra.mxu1 %v1858_v45 }
 0x596   :  { %1860 = vmatprep.subr.bf16.mxu1 %v2060_v0 }
 0x599   :  { %1862 = vmatpush3.bf16.msra.mxu1 %v1861_v48 }
 0x59a   :  { %1863 = vmatprep.subr.bf16.mxu1 %v2060_v0 }
 0x59d   :  { %1865 = vmatpush3.bf16.msra.mxu1 %v1864_v51 }
 0x59e   :  { %1866 = vmatprep.subr.bf16.mxu1 %v2060_v0 }
 0x5a1   :  { %1868 = vmatpush3.bf16.msra.mxu1 %v1867_v54 }
 0x5a2   :  { %1869 = vmatprep.subr.bf16.mxu1 %v2060_v0 }
 0x5a5   :  { %1871 = vmatpush3.bf16.msra.mxu1 %v1870_v57 }
 0x5a6   :  { %1872 = vmatprep.subr.bf16.mxu1 %v2060_v0 }
 0x5a9   :  { %1874 = vmatpush3.bf16.msra.mxu1 %v1873_v5 }
 0x5aa   :  { %1875 = vmatprep.subr.bf16.mxu1 %v2060_v0 }
 0x5ad   :  { %1877 = vmatpush3.bf16.msra.mxu1 %v1876_v11 }
 0x663   :  { %v754_v60 = vpop.f32.mrb[6].mxu1 }
 0x664   :  { %v758_v61 = vadd.f32 %v754_v60, %v226_v59  ;;  %v1524_v62 = vpop.f32.mrb[7].mxu1 }
 0x666   :  { %v759_v63 = vmax.f32 %v758_v61, 0.0 }
 0x668   :  { %v760_v2 = vadd.f32 %v759_v63, %v687_v39  ;;  %1558 = vmatmul.mubr.f32.vlgmr.msra.gmra.mrb[14].mxu0 %v759_v63  ;;  %v1900_v39 = vpack.c.bf16 %v943_v34, %v942_v28 }
 0x669   :  { %1627 = vmatprep.mubr.msk.f32.mxu0 %vm2061_vm0, %v2062_v1  ;;  %1880 = vmatpush3.bf16.msra.mxu0 %v1879_v14  ;;  %v932_v1 = vld [vmem:[#allocation10 + $0x20] sm:$0xff] }
 0x66a   :  { %1881 = vmatprep.subr.bf16.mxu0 %v2060_v0  ;;  %v1885_v19 = vpack.c.bf16 %v933_v18, %v932_v1 }
 0x66d   :  { %1883 = vmatpush3.bf16.msra.mxu0 %v1882_v17 }
 0x66e   :  { %1884 = vmatprep.subr.bf16.mxu0 %v2060_v0 }
 0x671   :  { %1886 = vmatpush3.bf16.msra.mxu0 %v1885_v19 }
 0x672   :  { %1887 = vmatprep.subr.bf16.mxu0 %v2060_v0 }
 0x675   :  { %1889 = vmatpush3.bf16.msra.mxu0 %v1888_v23 }
 0x676   :  { %1890 = vmatprep.subr.bf16.mxu0 %v2060_v0 }
 0x679   :  { %1892 = vmatpush3.bf16.msra.mxu0 %v1891_v26 }
 0x67a   :  { %1893 = vmatprep.subr.bf16.mxu0 %v2060_v0 }
 0x67d   :  { %1895 = vmatpush3.bf16.msra.mxu0 %v1894_v30 }
 0x67e   :  { %1896 = vmatprep.subr.bf16.mxu0 %v2060_v0 }
 0x681   :  { %1898 = vmatpush3.bf16.msra.mxu0 %v1897_v33 }
 0x682   :  { %1899 = vmatprep.subr.bf16.mxu0 %v2060_v0 }
 0x685   :  { %1901 = vmatpush3.bf16.msra.mxu0 %v1900_v39 }
 0x73b   :  { %v827_v36 = vpop.f32.mrb[14].mxu0 }
 0x73c   :  { %v831_v37 = vadd.f32 %v827_v36, %v231_v35  ;;  %v1559_v38 = vpop.f32.mrb[15].mxu0 }
 0x73e   :  { %v832_v9 = vmax.f32 %v831_v37, 0.0 }
 0x740   :  { %v833_v15 = vadd.f32 %v832_v9, %v760_v2 }
 0x742   :  { %v834_v21 = vmul.f32 0.125, %v833_v15 }
 0x744   :  { %1593 = vmatmul.mubr.f32.vlgmr.msra.gmra.mrb[8].mxu1 %v834_v21 }
 0x817   :  { %v924_v41 = vpop.f32.mrb[8].mxu1 }
 0x818   :  { %v925_v0 = vadd.f32 %v1040_v40, %v924_v41  ;;  %v1594_v42 = vpop.f32.mrb[9].mxu1 }
 0x81a   :  { %1628 = vmatmul.mubr.f32.vlgmr.msra.gmra.mrb[16].mxu0 %v925_v0 }
 0x8ed   :  { %v1017_v8 = vpop.f32.mrb[16].mxu0 }
 0x8ee   :  { %v1018_v43 = vadd.f32 %v1041_v58, %v1017_v8  ;;  %v1629_v44 = vpop.f32.mrb[17].mxu0 }
 0x8f0   :  { %1021 = vst [vmem:[#allocation11] sm:$0xff] %v1018_v43 }
 0x8f1   :  { %2034 = shalt.err (!%p2031_p2)
}
 0x8f2   :  { %s2035_s27 = scalar_lea.hbm %s2433_s8, 128 }
 0x8f3   :  { %p2036_p3 = scmp.ne.s32.totalorder %s2433_s8, %s2035_s27  ;;  %p2039_p4 = scmp.lt.u32.totalorder %s2035_s27, %s2433_s8 }
 0x8f5   :  { %p2041_p5 = pnand %p2039_p4, %p2036_p3 }
 0x8f7   :  { %2044 = shalt.err (!%p2041_p5)
}
 0x8f8   :  { %1031 = dma.vmem_to_hbm [thread:$0]  %s1029_s24, 128, %s2433_s8, [#allocation4]  }
 0x8f9   :  { %2051 = dma.done.wait [#allocation4], 128  }
 0x8fa   :  { %2052 = vsyncadd [#allocation4], 4294967168 }
 0x8fb   :  { %1035 = vsyncpa [#allocation3], 1 }
 0x8fc   :  { %1036 = vsyncpa [#allocation6], 1 }
 0x8fd   :  { %1037 = vsyncpa [#allocation9], 1 }
 0x8fe   :  { %1038 = vsyncpa [#allocation4], 1 }

</bundles_post_ra>
